<compile_context>
chip_gen: v7x
topology: tpu7x:2x2x1
jax: 0.10.0
libtpu: 0.0.40
codegen_flags: <defaults>
</compile_context>

<pallas_src>
import functools

import jax
import jax.numpy as jnp
import numpy as np
from jax.experimental import pallas as pl
from jax.experimental.pallas import tpu as pltpu


# ----------------------- fused dense apply (hot path) ------------------------

def _dense_matmul_kernel(x_ref, w_ref, y_ref):
    # One batch tile: (tb, d_in) @ (d_in, d_out) on the MXU, f32 accumulation.
    y_ref[...] = jnp.dot(x_ref[...], w_ref[...],
                         preferred_element_type=jnp.float32).astype(y_ref.dtype)


def tt_dense_apply(x, w, *, block_b=512):
    """y = x @ w with the batch dimension tiled; w stays resident in VMEM."""
    B, d_in = x.shape
    d_in2, d_out = w.shape
    assert d_in == d_in2

    # Batch tile: full B when small (block == full dim is always legal), else 512 rows
    # (divisible by 8; last partial block is masked by the Pallas pipeline).
    tb = B if B <= block_b else block_b
    grid = (pl.cdiv(B, tb),)

    cost = pl.CostEstimate(
        flops=2 * B * d_in * d_out,
        transcendentals=0,
        bytes_accessed=4 * (B * d_in + d_in * d_out + B * d_out),
    )

    return pl.pallas_call(
        _dense_matmul_kernel,
        out_shape=jax.ShapeDtypeStruct((B, d_out), jnp.float32),
        grid=grid,
        in_specs=[
            pl.BlockSpec((tb, d_in), lambda i: (i, 0)),      # x: tiled over batch
            pl.BlockSpec((d_in, d_out), lambda i: (0, 0)),   # W: resident block
        ],
        out_specs=pl.BlockSpec((tb, d_out), lambda i: (i, 0)),
        compiler_params=pltpu.CompilerParams(
            dimension_semantics=("parallel",),               # megacore-shardable on v7x
            vmem_limit_bytes=32 * 1024 * 1024,
        ),
        cost_estimate=cost,
    )(x, w)


# ---------------------- TT dropout -> dense weight (glue) --------------------

def tt_dropout_dense_weight(core1, core2, *, proba, min_dim, key, training=True):
    """Collapse the (masked + scaled) 2-core TT-matrix into a dense W (d_in, d_out)."""
    g1 = core1[0]            # (m1, n1, r)   squeeze boundary rank 1
    g2 = core2[..., 0]       # (r, m2, n2)   squeeze boundary rank 1
    m1, n1, r = g1.shape
    _, m2, n2 = g2.shape

    if proba and training:
        scaling = 1.0 / (1.0 - proba)
        if r > min_dim:
            k_keep, k_fb = jax.random.split(key)
            keep = jax.random.bernoulli(k_keep, 1.0 - proba, (r,))
            # if all bond slices were dropped, keep one random index
            fallback = jnp.zeros((r,), jnp.bool_).at[
                jax.random.randint(k_fb, (), 0, r)].set(True)
            keep = jnp.where(jnp.any(keep), keep, fallback)
        else:
            keep = jnp.ones((r,), jnp.bool_)
        # Fold the 0/1 bond mask and BOTH per-core 1/(1-p) scalings into g1 only
        # (mask^2 == mask; reference scales each core, so the net factor is scaling^2).
        # TODO(synk): reference index_select yields dynamically-shaped (smaller-rank) cores;
        #             with static TPU shapes an equivalent 0/1 bond mask is used instead.
        g1 = g1 * (keep.astype(g1.dtype) * (scaling * scaling))[None, None, :]

    # W[(i1,i2),(j1,j2)] = sum_a g1[i1,j1,a] * g2[a,i2,j2]   (tiny: 32x32 here)
    w = jnp.einsum('pma,aqn->pqmn', g1, g2).reshape(m1 * m2, n1 * n2)
    return w


def tt_dropout_forward(x, core1, core2, key, *, proba, min_dim, training=True):
    w = tt_dropout_dense_weight(core1, core2, proba=proba, min_dim=min_dim,
                                key=key, training=training)
    return tt_dense_apply(x, w)


# ----------------------------------- main ------------------------------------

if __name__ == "__main__":
    key = jax.random.PRNGKey(0)
    k_x, k_c1, k_c2, k_drop = jax.random.split(key, 4)

    B = 8
    m1, m2 = 4, 8            # d_in  = 32
    n1, n2 = 8, 4            # d_out = 32
    rank = 8
    proba, min_dim = 0.5, 1

    x = jax.random.normal(k_x, (B, m1 * m2), jnp.float32)
    core1 = 0.3 * jax.random.normal(k_c1, (1, m1, n1, rank), jnp.float32)
    core2 = 0.3 * jax.random.normal(k_c2, (rank, m2, n2, 1), jnp.float32)

    fwd = jax.jit(functools.partial(tt_dropout_forward,
                                    proba=proba, min_dim=min_dim, training=True))
    y = fwd(x, core1, core2, k_drop)
    y = jax.block_until_ready(y)

    # pure-JAX reference: original two-core masked/scaled formulation
    # (same key -> same bernoulli draw as inside tt_dropout_dense_weight)
    g1 = core1[0]
    g2 = core2[..., 0]
    scaling = 1.0 / (1.0 - proba)
    k_keep, k_fb = jax.random.split(k_drop)
    keep = jax.random.bernoulli(k_keep, 1.0 - proba, (rank,))
    fallback = jnp.zeros((rank,), jnp.bool_).at[
        jax.random.randint(k_fb, (), 0, rank)].set(True)
    keep = jnp.where(jnp.any(keep), keep, fallback)
    mask = keep.astype(jnp.float32)
    g1m = g1 * mask[None, None, :] * scaling
    g2m = g2 * mask[:, None, None] * scaling
    w_ref = jnp.einsum('pma,aqn->pqmn', g1m, g2m).reshape(m1 * m2, n1 * n2)
    y_ref = x @ w_ref

    np.testing.assert_allclose(np.asarray(y), np.asarray(y_ref), rtol=1e-5, atol=1e-5)

    print("KERNEL_OK")
</pallas_src>

<mosaic_0001>
module attributes {stable_mosaic.version = 11 : i64} {
  func.func @_dense_matmul_kernel(%arg0: i32, %arg1: memref<8x32xf32, #tpu.memory_space<vmem>>, %arg2: memref<32x32xf32, #tpu.memory_space<vmem>>, %arg3: memref<8x32xf32, #tpu.memory_space<vmem>>) attributes {dimension_semantics = [#tpu.dimension_semantics<parallel>], iteration_bounds = array<i64: 1>, scalar_prefetch = 0 : i64, scratch_operands = 0 : i64, tpu.core_type = #tpu.core_type<tc>, window_params = [{transform_indices = @transform_0, window_bounds = array<i64: 8, 32>}, {pipeline_mode = #tpu.pipeline_mode<synchronous>, transform_indices = @transform_1, window_bounds = array<i64: 32, 32>}, {transform_indices = @transform_2, window_bounds = array<i64: 8, 32>}]} {
    %c0 = arith.constant 0 : index
    %c0_0 = arith.constant 0 : index
    %0 = vector.load %arg1[%c0, %c0_0] : memref<8x32xf32, #tpu.memory_space<vmem>>, vector<8x32xf32>
    %c0_1 = arith.constant 0 : index
    %c0_2 = arith.constant 0 : index
    %1 = vector.load %arg2[%c0_1, %c0_2] : memref<32x32xf32, #tpu.memory_space<vmem>>, vector<32x32xf32>
    %cst = arith.constant dense<0.000000e+00> : vector<8x32xf32>
    %2 = tpu.matmul %0, %1, %cst {dimension_numbers = #tpu.dot_dimension_numbers<[1], [0], [0], [1], [0, 0, 1, 1], [], []>} : vector<8x32xf32>, vector<32x32xf32>, vector<8x32xf32> -> vector<8x32xf32>
    %c0_3 = arith.constant 0 : index
    %c0_4 = arith.constant 0 : index
    %3 = vector.load %arg3[%c0_3, %c0_4] : memref<8x32xf32, #tpu.memory_space<vmem>>, vector<8x32xf32>
    tpu.vector_store %arg3[%c0_3, %c0_4], %2 {strides = array<i32>} : memref<8x32xf32, #tpu.memory_space<vmem>>, vector<8x32xf32>,
    return
  }
  func.func @transform_0(%arg0: i32) -> (i32, i32) {
    %c0_i32 = arith.constant 0 : i32
    %c0_i32_0 = arith.constant 0 : i32
    return %arg0, %c0_i32 : i32, i32
  }
  func.func @transform_1(%arg0: i32) -> (i32, i32) {
    %c0_i32 = arith.constant 0 : i32
    %c0_i32_0 = arith.constant 0 : i32
    %c0_i32_1 = arith.constant 0 : i32
    return %c0_i32, %c0_i32_0 : i32, i32
  }
  func.func @transform_2(%arg0: i32) -> (i32, i32) {
    %c0_i32 = arith.constant 0 : i32
    %c0_i32_0 = arith.constant 0 : i32
    return %arg0, %c0_i32 : i32, i32
  }
}

</mosaic_0001>

<bundles_post_ra>
// kernel: tt_dropout_forward.1
= control target key start
LH: loop header
LB: loop body
LE: loop exit
PB: predicated region body
PF: predicated region fallthrough
CT: control target
= control target key end

     0   :  { %v157_v3 = vmov 0.0|0.0   ;;  %vm158_vm0 = vmmov 0   ;;  %v159_v6 = vmov 0.0   ;;  %s203_s0 = inlined_call_operand.vmem [shape: f32[8,32], index: 0, kind: input, shape index: {}]   ;;  %s204_s1 = inlined_call_operand.vmem [shape: f32[32,32], index: 1, kind: input, shape index: {}]   ;;  %s205_s2 = inlined_call_operand.hbm [shape: f32[8,32], index: 2, kind: output, shape index: {}]  }
   0x1   :  { %v13_v0 = vld [vmem:[%s204_s1] sm:$0xff]  ;;  %v14_v1 = vld [vmem:[%s204_s1 + $0x8] sm:$0xff]  ;;  %v15_v2 = vld [vmem:[%s204_s1 + $0x10] sm:$0xff]  ;;  %123 = vmatprep.subr.bf16.mxu0 %v157_v3  ;;  %120 = vmatprep.mubr.msk.f32.mxu0 %vm158_vm0, %v159_v6 }
   0x2   :  { %v124_v4 = vpack.c.bf16 %v14_v1, %v13_v0  ;;  %v16_v5 = vld [vmem:[%s204_s1 + $0x18] sm:$0xff] }
   0x3   :  { %7 = vsyncpa [#allocation3], 0  ;;  %v127_v7 = vpack.c.bf16 %v16_v5, %v15_v2  ;;  %v12_v8 = vld [vmem:[%s203_s0] sm:$0xff]  ;;  %vm17_vm1 = vcmask 261120   ;;  %s160_s19 = smov [#allocation2]  }
   0x4   :  { %125 = vmatpush3.bf16.msra.mxu0 %v124_v4  ;;  %s98_s20 = sshll.u32 %s160_s19, 4  ;;  %s99_s20 = int_to_ptr.vmem [resolvable:$true] %s98_s20 }
   0x5   :  { %126 = vmatprep.subr.bf16.mxu0 %v157_v3  ;;  %s133_s1 = scalar_lea.vmem %s99_s20, 128  ;;  %p138_p1 = scmp.lt.s32.totalorder %s99_s20, %s99_s20 }
   0x6   :  { %p134_p0 = scmp.ne.s32.totalorder %s99_s20, %s133_s1  ;;  %p139_p2 = scmp.lt.s32.totalorder %s133_s1, %s133_s1 }
   0x8   :  { %128 = vmatpush3.bf16.msra.mxu0 %v127_v7  ;;  %p140_p3 = por %p139_p2, %p138_p1 }
   0xa   :  { %p141_p4 = pnand %p140_p3, %p134_p0 }
   0xb   :  { %121 = vmatmul.mubr.msk.f32.vlgmr.msra.gmra.mrb[0].mxu0 %vm17_vm1, %v12_v8 }
  0xde   :  { %v87_v9 = vpop.f32.mrb[0].mxu0 }
  0xdf   :  { %91 = vst.msk [vmem:[#allocation2] sm:$0xff] %vm17_vm1, %v87_v9  ;;  %v122_v10 = vpop.f32.mrb[1].mxu0 }
  0xe0   :  { %144 = shalt.err (!%p141_p4)
}
  0xe1   :  { %s145_s23 = scalar_lea.hbm %s205_s2, 128 }
  0xe2   :  { %p146_p5 = scmp.ne.s32.totalorder %s205_s2, %s145_s23  ;;  %p149_p6 = scmp.lt.u32.totalorder %s145_s23, %s205_s2 }
  0xe4   :  { %p151_p7 = pnand %p149_p6, %p146_p5 }
  0xe6   :  { %154 = shalt.err (!%p151_p7)
}
  0xe7   :  { %101 = dma.vmem_to_hbm [thread:$0]  %s99_s20, 128, %s205_s2, [#allocation3]  }
  0xe8   :  { %155 = dma.done.wait [#allocation3], 128  }
  0xe9   :  { %156 = vsyncadd [#allocation3], 4294967168 }
  0xea   :  { %105 = vsyncpa [#allocation3], 1 }

</bundles_post_ra>
